<compile_context>
chip_gen: v7x
topology: tpu7x:2x2x1
jax: 0.10.0
libtpu: 0.0.40
codegen_flags: <defaults>
</compile_context>

<pallas_src>
import functools

import jax
import jax.numpy as jnp
from jax import lax
from jax.experimental import pallas as pl
from jax.experimental.pallas import tpu as pltpu


def _seq_self_attn_kernel(x_ref, w_ref, o_ref, *, approx_recip):
    # x_ref: (Bb, S, Hp) block of (padded) lstm_out   (VMEM)
    # w_ref: (Hp, Hp)    (padded) attention weights   (VMEM, grid-resident)
    # o_ref: (Bb, S, Hp) attention output             (VMEM, lane-dense stores)
    x = x_ref[...]            # keep input dtype: bf16 operands run at full MXU rate
    w = w_ref[...]
    Bb, S, Hp = x.shape

    # x @ W with the (Bb, S) rows fused into the MXU M dimension
    # (leading-dim reshape only; lane/sublane layout untouched).
    xw = jnp.dot(x.reshape(Bb * S, Hp), w,
                 preferred_element_type=jnp.float32).reshape(Bb, S, Hp)
    xw = xw.astype(x.dtype)

    # scores[b] = (x[b] @ W) @ x[b]^T as a batched contraction over the last
    # dims of both operands -> no explicit x.T / XLU transpose.
    scores = lax.dot_general(
        xw, x,
        dimension_numbers=(((2,), (2,)), ((0,), (0,))),
        preferred_element_type=jnp.float32)                     # (Bb, S, S) f32
    scores = jnp.tanh(scores)

    # Softmax over the last dim.  tanh bounds scores to [-1, 1], so the usual
    # max-subtraction pass is redundant.  Softmax math stays f32 (v5e-safe).
    p = jnp.exp(scores)
    denom = jnp.sum(p, axis=-1, keepdims=True)                  # (Bb, S, 1)
    if approx_recip:
        # EUP vrcp slot (~1e-3 relative error); opt-in for inference only.
        p = p * pl.reciprocal(denom, approx=True)
    else:
        p = p / denom

    # attention_output[b] = p[b] @ x[b]
    out = lax.dot_general(
        p.astype(x.dtype), x,
        dimension_numbers=(((2,), (1,)), ((0,), (0,))),
        preferred_element_type=jnp.float32)                     # (Bb, S, Hp)
    o_ref[...] = out.astype(o_ref.dtype)


def _vmem_capacity_bytes(default=64 * 1024 * 1024):
    """Physical VMEM per core (128 MiB v5e/v6e, 64 MiB v7x); safe fallback."""
    try:
        return int(pltpu.get_tpu_info().vmem_capacity_bytes)
    except Exception:
        return default


def _pick_batch_block(B, S, Hp, itemsize, budget_bytes):
    """Largest divisor of B whose real pipeline working set fits the budget,
    capped at B//2 so the grid has >= 2 steps (megacore + pipelining)."""
    per_batch = (2 * 2 * S * Hp * itemsize      # double-buffered x and out blocks
                 + 4 * (S * S                   # f32 scores / p
                        + 2 * S * Hp))          # f32 xw + f32 out accumulation
    bb = max(1, min(B, budget_bytes // max(per_batch, 1)))
    bb = min(bb, max(1, B // 2))                # keep the grid >= 2 steps
    while B % bb:
        bb -= 1
    return bb


def seq_self_attention(lstm_out, attention_weights, *, batch_block=None,
                       approx_softmax_recip=False):
    """Multiplicative SeqSelfAttention forward pass.

    lstm_out: (B, S, H)
    attention_weights: (H, H)
    returns: (B, S, H) in lstm_out.dtype
    """
    B, S, H = lstm_out.shape
    assert attention_weights.shape == (H, H)

    # Pad the hidden/attention dim up to a multiple of 128 lanes.  Zero-padded
    # rows/cols of W and zero-padded features of x contribute exactly zero to
    # every contraction, so the math is unchanged; the payoff is lane-dense
    # loads/stores and MXU-native K/N on all generations.
    Hp = ((H + 127) // 128) * 128
    if Hp != H:
        lstm_in = jnp.pad(lstm_out, ((0, 0), (0, 0), (0, Hp - H)))
        w_in = jnp.pad(attention_weights, ((0, Hp - H), (0, Hp - H)))
    else:
        lstm_in, w_in = lstm_out, attention_weights

    itemsize = jnp.dtype(lstm_out.dtype).itemsize
    cap = _vmem_capacity_bytes()
    budget = max(8 * 1024 * 1024, cap // 5)     # per-stage budget, gen-aware

    Bb = (batch_block if batch_block is not None
          else _pick_batch_block(B, S, Hp, itemsize, budget))
    assert B % Bb == 0, "batch_block must divide B"

    # Scoped-VMEM limit: double-buffered in/out blocks + resident weights +
    # f32 intermediates, clamped to ~75% of physical VMEM (headroom for
    # Mosaic internal scratch).
    block_bytes = Bb * S * Hp * itemsize
    vmem_needed = (2 * 2 * block_bytes
                   + 2 * Hp * Hp * itemsize
                   + 4 * Bb * (S * S + 2 * S * Hp))
    vmem_limit = int(min(max(2 * vmem_needed, 32 * 1024 * 1024),
                         (3 * cap) // 4))

    kernel = functools.partial(_seq_self_attn_kernel,
                               approx_recip=approx_softmax_recip)

    out_p = pl.pallas_call(
        kernel,
        out_shape=jax.ShapeDtypeStruct((B, S, Hp), lstm_out.dtype),
        grid_spec=pltpu.PrefetchScalarGridSpec(
            num_scalar_prefetch=0,
            grid=(B // Bb,),
            in_specs=[
                pl.BlockSpec((Bb, S, Hp), lambda b: (b, 0, 0)),
                pl.BlockSpec((Hp, Hp), lambda b: (0, 0)),
            ],
            out_specs=pl.BlockSpec((Bb, S, Hp), lambda b: (b, 0, 0)),
        ),
        compiler_params=pltpu.CompilerParams(
            dimension_semantics=("parallel",),
            vmem_limit_bytes=vmem_limit,
        ),
    )(lstm_in, w_in)

    return out_p[..., :H] if Hp != H else out_p


def _reference(lstm_out, w):
    # Precision.HIGHEST keeps the reference genuinely f32 (XLA's DEFAULT TPU
    # matmul precision demotes f32 operands to bf16 passes, which is far
    # noisier than the kernel).
    hi = lax.Precision.HIGHEST
    s = jnp.matmul(lstm_out, w, precision=hi)
    s = jnp.matmul(s, jnp.swapaxes(lstm_out, 1, 2), precision=hi)
    s = jnp.tanh(s)
    p = jax.nn.softmax(s, axis=-1)
    return jnp.matmul(p, lstm_out, precision=hi)


if __name__ == "__main__":
    key = jax.random.PRNGKey(0)
    k_x, k_w = jax.random.split(key)

    B, S, H = 2, 8, 32          # attention_size = hidden = 32 (small synthetic size)

    lstm_out = jax.random.normal(k_x, (B, S, H), dtype=jnp.float32)

    # xavier_uniform_ init for attention_weights (H, H)
    bound = (6.0 / (H + H)) ** 0.5
    attention_weights = jax.random.uniform(
        k_w, (H, H), dtype=jnp.float32, minval=-bound, maxval=bound
    )

    out = seq_self_attention(lstm_out, attention_weights)
    out = jax.block_until_ready(out)

    ref = _reference(lstm_out, attention_weights)
    assert out.shape == (B, S, H)
    # Tolerance leaves margin for MXU f32 multi-pass rounding and EUP
    # transcendental approximations; both sides are otherwise exact f32.
    assert jnp.allclose(out, ref, atol=5e-3, rtol=5e-3), "mismatch vs reference"

    print("KERNEL_OK")
</pallas_src>

<mosaic_0001>
module attributes {stable_mosaic.version = 11 : i64} {
  func.func @_seq_self_attn_kernel(%arg0: i32, %arg1: memref<1x8x128xf32, #tpu.memory_space<vmem>>, %arg2: memref<128x128xf32, #tpu.memory_space<vmem>>, %arg3: memref<1x8x128xf32, #tpu.memory_space<vmem>>) attributes {dimension_semantics = [#tpu.dimension_semantics<parallel>], iteration_bounds = array<i64: 2>, scalar_prefetch = 0 : i64, scratch_operands = 0 : i64, tpu.core_type = #tpu.core_type<tc>, window_params = [{transform_indices = @transform_0, window_bounds = array<i64: 1, 8, 128>}, {pipeline_mode = #tpu.pipeline_mode<synchronous>, transform_indices = @transform_1, window_bounds = array<i64: 128, 128>}, {transform_indices = @transform_2, window_bounds = array<i64: 1, 8, 128>}]} {
    %c0 = arith.constant 0 : index
    %c0_0 = arith.constant 0 : index
    %c0_1 = arith.constant 0 : index
    %0 = vector.load %arg1[%c0, %c0_0, %c0_1] : memref<1x8x128xf32, #tpu.memory_space<vmem>>, vector<1x8x128xf32>
    %c0_2 = arith.constant 0 : index
    %c0_3 = arith.constant 0 : index
    %1 = vector.load %arg2[%c0_2, %c0_3] : memref<128x128xf32, #tpu.memory_space<vmem>>, vector<128x128xf32>
    %2 = vector.shape_cast %0 : vector<1x8x128xf32> to vector<8x128xf32>
    %cst = arith.constant dense<0.000000e+00> : vector<8x128xf32>
    %3 = tpu.matmul %2, %1, %cst {dimension_numbers = #tpu.dot_dimension_numbers<[1], [0], [0], [1], [0, 0, 1, 1], [], []>} : vector<8x128xf32>, vector<128x128xf32>, vector<8x128xf32> -> vector<8x128xf32>
    %4 = vector.shape_cast %3 : vector<8x128xf32> to vector<1x8x128xf32>
    %cst_4 = arith.constant dense<0.000000e+00> : vector<1x8x8xf32>
    %5 = tpu.matmul %4, %0, %cst_4 {dimension_numbers = #tpu.dot_dimension_numbers<[2], [2], [1], [1], [0, 0, 0, 1, 1, 1], [0], [0]>} : vector<1x8x128xf32>, vector<1x8x128xf32>, vector<1x8x8xf32> -> vector<1x8x8xf32>
    %6 = math.tanh %5 : vector<1x8x8xf32>
    %7 = math.exp %6 : vector<1x8x8xf32>
    %cst_5 = arith.constant dense<0.000000e+00> : vector<1x8xf32>
    %8 = vector.multi_reduction <add>, %7, %cst_5 [2] : vector<1x8x8xf32> to vector<1x8xf32>
    %9 = vector.shape_cast %8 : vector<1x8xf32> to vector<1x8x1xf32>
    %10 = vector.broadcast %9 : vector<1x8x1xf32> to vector<1x8x8xf32>
    %11 = arith.divf %7, %10 : vector<1x8x8xf32>
    %cst_6 = arith.constant dense<0.000000e+00> : vector<1x8x128xf32>
    %12 = tpu.matmul %11, %0, %cst_6 {dimension_numbers = #tpu.dot_dimension_numbers<[2], [1], [1], [2], [0, 0, 0, 1, 1, 2], [0], [0]>} : vector<1x8x8xf32>, vector<1x8x128xf32>, vector<1x8x128xf32> -> vector<1x8x128xf32>
    %c0_7 = arith.constant 0 : index
    %c0_8 = arith.constant 0 : index
    %c0_9 = arith.constant 0 : index
    %13 = vector.load %arg3[%c0_7, %c0_8, %c0_9] : memref<1x8x128xf32, #tpu.memory_space<vmem>>, vector<1x8x128xf32>
    tpu.vector_store %arg3[%c0_7, %c0_8, %c0_9], %12 {strides = array<i32>} : memref<1x8x128xf32, #tpu.memory_space<vmem>>, vector<1x8x128xf32>,
    return
  }
  func.func @transform_0(%arg0: i32) -> (i32, i32, i32) {
    %c0_i32 = arith.constant 0 : i32
    %c0_i32_0 = arith.constant 0 : i32
    %c0_i32_1 = arith.constant 0 : i32
    return %arg0, %c0_i32, %c0_i32_0 : i32, i32, i32
  }
  func.func @transform_1(%arg0: i32) -> (i32, i32) {
    %c0_i32 = arith.constant 0 : i32
    %c0_i32_0 = arith.constant 0 : i32
    %c0_i32_1 = arith.constant 0 : i32
    return %c0_i32, %c0_i32_0 : i32, i32
  }
  func.func @transform_2(%arg0: i32) -> (i32, i32, i32) {
    %c0_i32 = arith.constant 0 : i32
    %c0_i32_0 = arith.constant 0 : i32
    %c0_i32_1 = arith.constant 0 : i32
    return %arg0, %c0_i32, %c0_i32_0 : i32, i32, i32
  }
}

</mosaic_0001>

<bundles_post_ra>
// kernel: tpu_custom_call.1
= control target key start
LH: loop header
LB: loop body
LE: loop exit
PB: predicated region body
PF: predicated region fallthrough
CT: control target
= control target key end

     0   :  { %7 = vsyncpa [#allocation3], 0  ;;  %s1037_s0 = inlined_call_operand.hbm [shape: f32[2,8,128], index: 0, kind: input, shape index: {}]   ;;  %s1038_s1 = inlined_call_operand.hbm [shape: f32[128,128], index: 1, kind: input, shape index: {}]   ;;  %s1039_s2 = inlined_call_operand.hbm [shape: f32[2,8,128], index: 2, kind: output, shape index: {}]  }
   0x1   :  { %9 = vsyncpa [#allocation3 + $0x1], 0 }
   0x2   :  { %10 = vsyncpa [#allocation6], 0 }
   0x3   :  { %11 = vsyncpa [#allocation4], 0 }
   0x4   :  { %13 = vsyncpa [#allocation4 + $0x1], 0  ;;  %s834_s9 = smov 0   ;;  %s836_s10 = smov 0  }
   0x5   :  { %s838_s11 = smov 0   ;;  %s840_s12 = smov 0  }
   0x6 LB: > { %s855_s13 = sadd.s32 4294967295, %s809_s12   ;;  %s508_s14 = sadd.s32 4294967294, %s809_s12   ;;  %s809_s12 = sphi %s840_s12, %s1059_s12   ;;  %s805_s11 = sphi %s838_s11, %s1058_s11   ;;  %s801_s10 = sphi %s836_s10, %s1057_s10   ;;  %s797_s9 = sphi %s834_s9, %s1056_s9  }
   0x7   : > { %p39_p0 = scmp.ne.s32.totalorder %s801_s10, %s797_s9  ;;  %p1040_p1 = scmp.eq.s32.totalorder %s855_s13, 0 }
   0x8   : > { %p90_p3 = scmp.eq.s32.totalorder %s508_s14, 1  ;;  %p509_p5 = scmp.ge.s32.totalorder %s809_s12, 1 }
   0x9   : > { %p864_p4 = por %p1040_p1, %p39_p0  ;;  %p97_p7 = scmp.lt.s32.totalorder %s809_s12, 3 }
   0xa   : > { %p869_p6 = por %p90_p3, %p39_p0  ;;  %s811_s18 = smov [#allocation5]  }
   0xb   : > { %s1043_s15 = scalar_select %p864_p4, 1, 0 }
   0xc   : > { %s1044_s16 = scalar_select %p869_p6, 1, 0 }
   0xd   : > { %p874_p8 = pnand %p509_p5, %p97_p7  ;;  %s109_s19 = sshll.u32 %s811_s18, 4  ;;  %s878_s19 = int_to_ptr.vmem [resolvable:$true] %s109_s19 }
   0xe   : > { %s890_s21 = sadd.s32 1, %s809_s12   ;;  %s26_s22 = sadd.s32 1, %s805_s11 }
   0xf   : > { %s1045_s17 = scalar_select %p874_p8, 1, 0 }
  0x10   : > { %p621_p9 = pneg %p874_p8  ;;  %s23_s23 = ssub.s32 %s809_s12, %s890_s21 }
  0x11   : > { %s681_s26 = scalar_lea.hbm %s1038_s1, 2048 }
  0x12   : > { %p885_p11 = pnand %p621_p9, %p1040_p1  ;;  %p682_p12 = scmp.ne.s32.totalorder %s1038_s1, %s681_s26 }
  0x13   : > { %p688_p5 = scmp.lt.u32.totalorder %s681_s26, %s1038_s1 }
  0x14   : > { %p683_p13 = pneg %p885_p11 }
  0x16   : > { %p684_p0 = pnand %p683_p13, %p682_p12 }
  0x18   : > { %p685_p3 = pneg %p684_p0 }
  0x1a   : > { %p690_p7 = pnand %p688_p5, %p685_p3 }
  0x1c   : > { %693 = shalt.err (!%p690_p7)
}
  0x1d   : > { %s694_s3 = scalar_lea.vmem %s878_s19, 2048  ;;  %p702_p2 = scmp.lt.s32.totalorder %s878_s19, %s878_s19 }
  0x1e   : > { %p695_p9 = scmp.ne.s32.totalorder %s878_s19, %s694_s3  ;;  %p703_p6 = scmp.lt.s32.totalorder %s694_s3, %s694_s3 }
  0x20   : > { %p697_p10 = pnand %p695_p9, %p683_p13  ;;  %p704_p4 = por %p703_p6, %p702_p2 }
  0x22   : > { %p698_p1 = pneg %p697_p10 }
  0x24   : > { %p705_p8 = pnand %p704_p4, %p698_p1 }
  0x26   : > { %708 = shalt.err (!%p705_p8)
}
  0x27   : > { %s812_s4 = smov 128   ;;  %s813_s5 = smov 8  }
  0x28   : > { %624 = dma.hbm_to_vmem [thread:$0]  (!%p885_p11), %s1038_s1, 2048, %s878_s19, [#allocation6], %s812_s4, %s812_s4, %s813_s5  }
  0x29   : > { %p24_p2 = scmp.eq.s32.totalorder %s23_s23, 0  ;;  %p33_p1 = scmp.ne.s32.totalorder %s805_s11, %s801_s10 }
  0x2a   : > { %p34_p4 = scmp.eq.s32.totalorder %s809_s12, 0  ;;  %p634_p6 = scmp.lt.s32.totalorder %s809_s12, 2 }
  0x2b   : > { %s921_s8 = scalar_select %p24_p2, %s805_s11, %s26_s22  }
  0x2c   : > { %p35_p8 = por %p34_p4, %p33_p1  ;;  %p1047_p10 = scmp.eq.s32.totalorder %s855_s13, 1 }
  0x2d   : > { %s123_s18 = sand.u32 1, %s805_s11   ;;  %s513_s24 = sshll.u32 %s809_s12, 7 }
  0x2e   : > { %p925_p12 = por %p1047_p10, %p33_p1  ;;  %s512_s25 = sshll.u32 %s123_s18, 3 }
  0x2f   : > { %s934_s27 = scalar_lea.hbm %s1037_s0, %s513_s24  ;;  %s127_s19 = scalar_lea.vmem [#allocation2], %s512_s25 }
  0x30   : > { %s134_s22 = sshll.u32 %s127_s19, 4  ;;  %p936_p11 = pnand %p634_p6, %p35_p8  ;;  %s940_s22 = int_to_ptr.vmem [resolvable:$true] %s134_s22 }
  0x31   : > { %s124_s28 = scalar_lea.sflag [#allocation3], %s123_s18  ;;  %s709_s29 = scalar_lea.hbm %s934_s27, 128 }
  0x32   : > { %p710_p13 = scmp.ne.s32.totalorder %s934_s27, %s709_s29  ;;  %p711_p0 = pneg %p936_p11 }
  0x33   : > { %s714_s4 = scalar_lea.hbm %s1037_s0, 256  ;;  %p715_p7 = scmp.lt.u32.totalorder %s934_s27, %s1037_s0 }
  0x34   : > { %p712_p3 = pnand %p711_p0, %p710_p13  ;;  %p716_p9 = scmp.lt.u32.totalorder %s714_s4, %s709_s29 }
  0x35   : > { %p718_p1 = scmp.lt.u32.totalorder %s709_s29, %s934_s27 }
  0x36   : > { %p713_p5 = pneg %p712_p3  ;;  %p717_p2 = por %p716_p9, %p715_p7 }
  0x38   : > { %p719_p4 = por %p718_p1, %p717_p2 }
  0x3a   : > { %p720_p6 = pnand %p719_p4, %p713_p5 }
  0x3c   : > { %723 = shalt.err (!%p720_p6)
}
  0x3d   : > { %s724_s7 = scalar_lea.vmem %s940_s22, 128  ;;  %s814_s18 = smov [#allocation2]  }
  0x3e   : > { %p725_p8 = scmp.ne.s32.totalorder %s940_s22, %s724_s7  ;;  %s729_s24 = sshll.u32 %s814_s18, 4  ;;  %s730_s24 = int_to_ptr.vmem [resolvable:$false] %s729_s24 }
  0x3f   : > { %s731_s25 = scalar_lea.vmem %s730_s24, 256  ;;  %p732_p3 = scmp.lt.s32.totalorder %s940_s22, %s730_s24 }
  0x40   : > { %p727_p10 = pnand %p725_p8, %p711_p0  ;;  %p733_p7 = scmp.lt.s32.totalorder %s731_s25, %s724_s7 }
  0x42   : > { %p728_p13 = pneg %p727_p10  ;;  %p734_p9 = por %p733_p7, %p732_p3 }
  0x44   : > { %p735_p2 = pnand %p734_p9, %p728_p13 }
  0x46   : > { %738 = shalt.err (!%p735_p2)
}
  0x47   : > { %628 = dma.hbm_to_vmem [thread:$0]  (!%p936_p11), %s934_s27, 128, %s940_s22, %s124_s28  }
  0x48   : > { %p1050_p5 = scmp.ne.s32.totalorder %s1045_s17, 0 }
  0x49   : > { %s970_s20 = sand.u32 (!%p1050_p5), 1, %s801_s10   ;;  %p1051_p0 = scmp.ne.s32.totalorder (!%p1050_p5), %s1043_s15, 0 }
  0x4a   : > { %143 = sbr.rel (%p1050_p5) target bundleno = 949 (0x3b5), region = 28  ;;  %s515_s26 = sshll.u32 (!%p1050_p5), %s970_s20, 3 }
  0x4b   : > { %s146_s19 = scalar_lea.sflag (!%p1050_p5), [#allocation3], %s970_s20  ;;  %s149_s29 = scalar_lea.vmem (!%p1050_p5), [#allocation2], %s515_s26 }
  0x51   : > { %784 = dma.done.wait (%p1051_p0), %s146_s19, 128  }
  0x52   : > { %786 = vsyncadd (%p1051_p0), %s146_s19, 4294967168  ;;  %p1052_p11 = scmp.eq.s32.totalorder %s855_s13, 0 }
  0x54   : > { %788 = dma.done.wait (%p1052_p11), [#allocation6], 2048   ;;  %p1053_p1 = pmov %p1052_p11 }
  0x55   : > { %v815_v0 = vmov 0.0|0.0   ;;  %vm816_vm0 = vmmov 0   ;;  %v817_v1 = vmov 0.0   ;;  %v175_v2 = vld [vmem:[#allocation5] sm:$0xff]  ;;  %v176_v3 = vld [vmem:[#allocation5 + $0x8] sm:$0xff]  ;;  %v177_v4 = vld [vmem:[#allocation5 + $0x10] sm:$0xff] }
  0x56   : > { %790 = vsyncadd (%p1053_p1), [#allocation6], 4294965248  ;;  %589 = vmatprep.subr.bf16.mxu0 %v815_v0  ;;  %576 = vmatprep.mubr.msk.f32.mxu0 %vm816_vm0, %v817_v1  ;;  %v590_v5 = vpack.c.bf16 %v176_v3, %v175_v2  ;;  %v178_v6 = vld [vmem:[#allocation5 + $0x18] sm:$0xff]  ;;  %v179_v8 = vld [vmem:[#allocation5 + $0x20] sm:$0xff]  ;;  %vm334_vm1 = vcmask 64512   ;;  %s173_s15 = scalar_lea.vmem [#allocation7], %s515_s26 }
  0x57   : > { %579 = vmatprep.subr.mxu1 %v817_v1  ;;  %581 = vmatprep.mubr.msk.f32.mxu1 %vm816_vm0, %v817_v1  ;;  %v593_v7 = vpack.c.bf16 %v178_v6, %v177_v4  ;;  %v180_v9 = vld [vmem:[#allocation5 + $0x28] sm:$0xff]  ;;  %v174_v10 = vld [vmem:[%s149_s29] sm:$0xff]  ;;  %v183_v15 = vld [vmem:[#allocation5 + $0x40] sm:$0xff]  ;;  %s428_s17 = sshll.u32 %s173_s15, 4  ;;  %s520_s27 = sshll.u32 %s855_s13, 7  ;;  %s990_s17 = int_to_ptr.vmem [resolvable:$true] %s428_s17 }
  0x58   : > { %591 = vmatpush3.bf16.msra.mxu0 %v590_v5  ;;  %580 = vmatpush3.xpose.msra.mxu1 %v174_v10  ;;  %v596_v11 = vpack.c.bf16 %v180_v9, %v179_v8  ;;  %v181_v12 = vld [vmem:[#allocation5 + $0x30] sm:$0xff]  ;;  %v182_v13 = vld [vmem:[#allocation5 + $0x38] sm:$0xff]  ;;  %v184_v16 = vld [vmem:[#allocation5 + $0x48] sm:$0xff]  ;;  %s995_s28 = scalar_lea.hbm %s1039_s2, %s520_s27  ;;  %s415_s30 = scalar_lea.sflag [#allocation4], %s970_s20 }
  0x59   : > { %592 = vmatprep.subr.bf16.mxu0 %v815_v0  ;;  %584 = vmatprep.subr.mxu1 %v817_v1  ;;  %v599_v14 = vpack.c.bf16 %v182_v13, %v181_v12  ;;  %v602_v17 = vpack.c.bf16 %v184_v16, %v183_v15  ;;  %v185_v18 = vld [vmem:[#allocation5 + $0x50] sm:$0xff]  ;;  %v186_v19 = vld [vmem:[#allocation5 + $0x58] sm:$0xff]  ;;  %v187_v21 = vld [vmem:[#allocation5 + $0x60] sm:$0xff]  ;;  %s739_s3 = scalar_lea.vmem %s990_s17, 128  ;;  %s818_s13 = smov [#allocation7]  }
  0x5a   : > { %v605_v20 = vpack.c.bf16 %v186_v19, %v185_v18  ;;  %v188_v22 = vld [vmem:[#allocation5 + $0x68] sm:$0xff]  ;;  %v189_v24 = vld [vmem:[#allocation5 + $0x70] sm:$0xff]  ;;  %v190_v25 = vld [vmem:[#allocation5 + $0x78] sm:$0xff]  ;;  %p740_p4 = scmp.ne.s32.totalorder %s990_s17, %s739_s3  ;;  %s743_s4 = sshll.u32 %s818_s13, 4  ;;  %s744_s4 = int_to_ptr.vmem [resolvable:$false] %s743_s4 }
  0x5b   : > { %v608_v23 = vpack.c.bf16 %v188_v22, %v187_v21  ;;  %v611_v26 = vpack.c.bf16 %v190_v25, %v189_v24  ;;  %s745_s5 = scalar_lea.vmem %s744_s4, 256  ;;  %p746_p10 = scmp.lt.s32.totalorder %s990_s17, %s744_s4 }
  0x5c   : > { %594 = vmatpush3.bf16.msra.mxu0 %v593_v7  ;;  %p741_p6 = pnand %p740_p4, %p925_p12  ;;  %p747_p13 = scmp.lt.s32.totalorder %s745_s5, %s739_s3 }
  0x5d   : > { %595 = vmatprep.subr.bf16.mxu0 %v815_v0 }
  0x5e   : > { %p742_p8 = pneg %p741_p6  ;;  %p748_p3 = por %p747_p13, %p746_p10 }
  0x60   : > { %597 = vmatpush3.bf16.msra.mxu0 %v596_v11  ;;  %p749_p7 = pnand %p748_p3, %p742_p8 }
  0x61   : > { %598 = vmatprep.subr.bf16.mxu0 %v815_v0 }
  0x64   : > { %600 = vmatpush3.bf16.msra.mxu0 %v599_v14 }
  0x65   : > { %601 = vmatprep.subr.bf16.mxu0 %v815_v0 }
  0x68   : > { %603 = vmatpush3.bf16.msra.mxu0 %v602_v17 }
  0x69   : > { %604 = vmatprep.subr.bf16.mxu0 %v815_v0 }
  0x6c   : > { %606 = vmatpush3.bf16.msra.mxu0 %v605_v20 }
  0x6d   : > { %607 = vmatprep.subr.bf16.mxu0 %v815_v0 }
  0x70   : > { %609 = vmatpush3.bf16.msra.mxu0 %v608_v23 }
  0x71   : > { %610 = vmatprep.subr.bf16.mxu0 %v815_v0 }
  0x74   : > { %612 = vmatpush3.bf16.msra.mxu0 %v611_v26 }
  0x77   : > { %577 = vmatmul.mubr.f32.vlgmr.msra.gmra.mrb[0].mxu0 %v174_v10 }
 0x14a   : > { %v257_v27 = vpop.f32.mrb[0].mxu0 }
 0x14b   : > { %v578_v28 = vpop.f32.mrb[1].mxu0  ;;  %582 = vmatmul.mubr.f32.vlgmr.msra.gmra.mrb[0].mxu1 %v257_v27 }
 0x14c   : > { %585 = vmatpush3.msra.mxu1 %v174_v10  ;;  %586 = vmatprep.mubr.msk.f32.mxu1 %vm816_vm0, %v817_v1 }
 0x21e   : > { %v327_v29 = vpop.f32.mrb[0].mxu1 }
 0x21f   : > { %675 = vtanh.f32 %v327_v29  ;;  %v583_v30 = vpop.f32.mrb[1].mxu1 }
 0x229   : > { %v676_v31 = vpop.eup %675 }
 0x22a   : > { %v332_v32 = vmul.f32 1.442695, %v676_v31 }
 0x22c   : > { %677 = vpow2.f32 %v332_v32 }
 0x236   : > { %v678_v33 = vpop.eup %677 }
 0x237   : > { %v335_v34 = vsel %vm334_vm1, %v678_v33, 0.0 }
 0x238   : > { %336 = vadd.xlane.f32.xlu0 %v335_v34 }
 0x2c5   : > { %v337_v35 = vpop.xlane.xlu0 %336 }
 0x2c6   : > { %679 = vrcp.f32 %v337_v35 }
 0x2d0   : > { %v680_v36 = vpop.eup %679 }
 0x2d1   : > { %v339_v37 = vmul.f32 %v680_v36, %v678_v33 }
 0x2d3   : > { %587 = vmatmul.mubr.msk.f32.vlgmr.msra.gmra.mrb[2].mxu1 %vm334_vm1, %v339_v37 }
 0x3a6   : > { %v409_v38 = vpop.f32.mrb[2].mxu1 }
 0x3a7   : > { %413 = vst [vmem:[%s173_s15] sm:$0xff] %v409_v38  ;;  %v588_v39 = vpop.f32.mrb[3].mxu1 }
 0x3a8   : > { %752 = shalt.err (!%p749_p7)
}
 0x3a9   : > { %s753_s6 = scalar_lea.hbm %s995_s28, 128  ;;  %s757_s24 = scalar_lea.hbm %s1039_s2, 256 }
 0x3aa   : > { %p754_p9 = scmp.ne.s32.totalorder %s995_s28, %s753_s6  ;;  %p758_p0 = scmp.lt.u32.totalorder %s995_s28, %s1039_s2 }
 0x3ab   : > { %p759_p11 = scmp.lt.u32.totalorder %s757_s24, %s753_s6  ;;  %p761_p4 = scmp.lt.u32.totalorder %s753_s6, %s995_s28 }
 0x3ac   : > { %p755_p2 = pnand %p754_p9, %p925_p12 }
 0x3ad   : > { %p760_p1 = por %p759_p11, %p758_p0 }
 0x3ae   : > { %p756_p5 = pneg %p755_p2 }
 0x3af   : > { %p762_p6 = por %p761_p4, %p760_p1 }
 0x3b1   : > { %p763_p8 = pnand %p762_p6, %p756_p5 }
 0x3b3   : > { %766 = shalt.err (!%p763_p8)
}
 0x3b4   : > { %619 = dma.vmem_to_hbm [thread:$0]  (%p925_p12), %s990_s17, 128, %s995_s28, %s415_s30  }
 0x3b5 PF: > { %s440_s26 = sand.u32 1, %s797_s9   ;;  %p1054_p10 = scmp.ne.s32.totalorder %s1044_s16, 0 }
 0x3b6   : > { %p1055_p13 = scmp.ge.s32.totalorder %s809_s12, 2  ;;  %s441_s19 = scalar_lea.sflag [#allocation4], %s440_s26 }
 0x3b8   : > { %p630_p3 = pnand %p1055_p13, %p1054_p10 }
 0x3ba   : > { %792 = dma.done.wait (!%p630_p3), %s441_s19, 128  }
 0x3bb   : > { %794 = vsyncadd (!%p630_p3), %s441_s19, 4294967168  ;;  %p16_p7 = scmp.ge.s32.totalorder %s890_s21, 4   ;;  %s1056_s9 = smov %s801_s10 }
 0x3bc   : > { %s1057_s10 = smov %s805_s11  ;;  %s1058_s11 = smov %s921_s8 }
 0x3bd   : > { %s1059_s12 = smov %s890_s21  ;;  %18 = sbr.rel (!%p16_p7) target bundleno = 6 (0x6), region = 77 }
 0x3c4   :  { %446 = vsyncpa [#allocation3], 1 }
 0x3c5   :  { %448 = vsyncpa [#allocation3 + $0x1], 1 }
 0x3c6   :  { %449 = vsyncpa [#allocation6], 1 }
 0x3c7   :  { %450 = vsyncpa [#allocation4], 1 }
 0x3c8   :  { %452 = vsyncpa [#allocation4 + $0x1], 1 }

</bundles_post_ra>
